<compile_context>
chip_gen: v7x
topology: tpu7x:2x2x1
jax: 0.10.0
libtpu: 0.0.40
codegen_flags: <defaults>
</compile_context>

<pallas_src>
import jax
import jax.numpy as jnp
from jax.experimental import pallas as pl
from jax.experimental.pallas import tpu as pltpu


def _shuffle_copy_kernel(x_ref, o_ref):
    # Pure copy: the shuffle is performed by the index_maps choosing the
    # permuted source slab.  The reshape only inserts/moves unit *leading*
    # dims — the last two (tiled) dims are identical on both sides, so it is
    # layout-free.
    o_ref[...] = x_ref[...].reshape(o_ref.shape)


# Per-buffer budget for one pipelined block.  Inputs and outputs are each
# double-buffered, so total VMEM is ~4x this — well inside the default scoped
# VMEM limit on v5e/v6e/v7x.
_BLOCK_BYTES_BUDGET = 2 << 20  # 2 MiB


def channel_shuffle(x: jax.Array, groups: int) -> jax.Array:
    """[N,C,H,W] -> view(N,g,C/g,H,W) -> permute(0,2,1,3,4) -> [N,C,H,W]."""
    N, C, H, W = x.shape
    g = int(groups)
    assert C % g == 0, f"Incompatible group size {g} for input channel {C}"
    cpg = C // g
    HW = H * W

    if g == 1 or cpg == 1:
        return x  # shuffle is the identity permutation

    itemsize = jnp.dtype(x.dtype).itemsize
    slab_bytes = N * g * HW * itemsize
    split_batch = (slab_bytes > _BLOCK_BYTES_BUDGET) and N > 1
    lane_dense = (HW % 128 == 0)

    if lane_dense:
        # Input viewed as (N, g, cpg*HW): the slab for output channel-group i
        # is x_in[:, :, i*HW:(i+1)*HW]  (== source channels j*cpg + i, all j).
        x_in = x.reshape(N, g, cpg * HW)
        out_shape = jax.ShapeDtypeStruct((N, cpg, g, HW), x.dtype)
        if split_batch:
            grid = (N, cpg)
            in_spec = pl.BlockSpec((1, g, HW), lambda n, i: (n, 0, i))
            out_spec = pl.BlockSpec((1, 1, g, HW), lambda n, i: (n, i, 0, 0))
        else:
            grid = (cpg,)
            in_spec = pl.BlockSpec((N, g, HW), lambda i: (0, 0, i))
            out_spec = pl.BlockSpec((N, 1, g, HW), lambda i: (0, i, 0, 0))
    else:
        # General fallback: keep (H, W) as the full last two block dims so the
        # BlockSpec tiling rules always hold (less lane-dense, still coarse).
        x_in = x.reshape(N, g, cpg, H, W)
        out_shape = jax.ShapeDtypeStruct((N, cpg, g, H, W), x.dtype)
        if split_batch:
            grid = (N, cpg)
            in_spec = pl.BlockSpec((1, g, 1, H, W), lambda n, i: (n, 0, i, 0, 0))
            out_spec = pl.BlockSpec((1, 1, g, H, W), lambda n, i: (n, i, 0, 0, 0))
        else:
            grid = (cpg,)
            in_spec = pl.BlockSpec((N, g, 1, H, W), lambda i: (0, 0, i, 0, 0))
            out_spec = pl.BlockSpec((N, 1, g, H, W), lambda i: (0, i, 0, 0, 0))

    out = pl.pallas_call(
        _shuffle_copy_kernel,
        out_shape=out_shape,
        grid_spec=pltpu.PrefetchScalarGridSpec(
            num_scalar_prefetch=0,
            grid=grid,
            in_specs=[in_spec],
            out_specs=out_spec,
        ),
        compiler_params=pltpu.CompilerParams(
            dimension_semantics=("parallel",) * len(grid),
        ),
    )(x_in)
    return out.reshape(N, C, H, W)


def channel_shuffle_ref(x: jax.Array, groups: int) -> jax.Array:
    """Pure-JAX reference matching the PyTorch forward exactly."""
    N, C, H, W = x.shape
    g = groups
    return (
        x.reshape(N, g, C // g, H, W)
        .transpose(0, 2, 1, 3, 4)
        .reshape(N, C, H, W)
    )


if __name__ == "__main__":
    key0, key1 = jax.random.split(jax.random.PRNGKey(0))

    # ChannelShuffle(groups=4) on NCHW; H*W = 256 -> lane-dense path, grid=(C//g,).
    N, C, H, W = 2, 8, 16, 16
    groups = 4
    x = jax.random.normal(key0, (N, C, H, W), dtype=jnp.float32)

    out = jax.block_until_ready(channel_shuffle(x, groups))
    ref = channel_shuffle_ref(x, groups)
    assert out.shape == ref.shape and out.dtype == ref.dtype
    assert jnp.array_equal(out, ref), "Pallas channel shuffle mismatch vs reference"

    # Second config on the same lane-dense path (different N / g / cpg, HW=128).
    x2 = jax.random.normal(key1, (1, 12, 8, 16), dtype=jnp.float32)
    out2 = jax.block_until_ready(channel_shuffle(x2, 3))
    assert jnp.array_equal(out2, channel_shuffle_ref(x2, 3)), "mismatch (cfg 2)"

    print("KERNEL_OK")
</pallas_src>

<mosaic_0001>
module attributes {stable_mosaic.version = 11 : i64} {
  func.func @_shuffle_copy_kernel(%arg0: i32, %arg1: memref<2x4x256xf32, #tpu.memory_space<vmem>>, %arg2: memref<2x1x4x256xf32, #tpu.memory_space<vmem>>) attributes {dimension_semantics = [#tpu.dimension_semantics<parallel>], iteration_bounds = array<i64: 2>, scalar_prefetch = 0 : i64, scratch_operands = 0 : i64, tpu.core_type = #tpu.core_type<tc>, window_params = [{transform_indices = @transform_0, window_bounds = array<i64: 2, 4, 256>}, {transform_indices = @transform_1, window_bounds = array<i64: 2, 1, 4, 256>}]} {
    %c0 = arith.constant 0 : index
    %c0_0 = arith.constant 0 : index
    %c0_1 = arith.constant 0 : index
    %0 = vector.load %arg1[%c0, %c0_0, %c0_1] : memref<2x4x256xf32, #tpu.memory_space<vmem>>, vector<2x4x256xf32>
    %1 = vector.shape_cast %0 : vector<2x4x256xf32> to vector<2x1x4x256xf32>
    %c0_2 = arith.constant 0 : index
    %c0_3 = arith.constant 0 : index
    %c0_4 = arith.constant 0 : index
    %c0_5 = arith.constant 0 : index
    %2 = vector.load %arg2[%c0_2, %c0_3, %c0_4, %c0_5] : memref<2x1x4x256xf32, #tpu.memory_space<vmem>>, vector<2x1x4x256xf32>
    tpu.vector_store %arg2[%c0_2, %c0_3, %c0_4, %c0_5], %1 {strides = array<i32>} : memref<2x1x4x256xf32, #tpu.memory_space<vmem>>, vector<2x1x4x256xf32>,
    return
  }
  func.func @transform_0(%arg0: i32) -> (i32, i32, i32) {
    %c0_i32 = arith.constant 0 : i32
    %c0_i32_0 = arith.constant 0 : i32
    %c0_i32_1 = arith.constant 0 : i32
    return %c0_i32, %c0_i32_0, %arg0 : i32, i32, i32
  }
  func.func @transform_1(%arg0: i32) -> (i32, i32, i32, i32) {
    %c0_i32 = arith.constant 0 : i32
    %c0_i32_0 = arith.constant 0 : i32
    %c0_i32_1 = arith.constant 0 : i32
    %c0_i32_2 = arith.constant 0 : i32
    return %c0_i32, %arg0, %c0_i32_0, %c0_i32_1 : i32, i32, i32, i32
  }
}

</mosaic_0001>

<bundles_post_ra>
// kernel: tpu_custom_call.1
= control target key start
LH: loop header
LB: loop body
LE: loop exit
PB: predicated region body
PF: predicated region fallthrough
CT: control target
= control target key end

     0   :  { %6 = vsyncpa [#allocation3], 0  ;;  %s575_s0 = inlined_call_operand.hbm [shape: f32[2,4,512], index: 0, kind: input, shape index: {}]   ;;  %s576_s1 = inlined_call_operand.hbm [shape: f32[2,2,4,256], index: 1, kind: output, shape index: {}]  }
   0x1   :  { %8 = vsyncpa [#allocation3 + $0x1], 0 }
   0x2   :  { %9 = vsyncpa [#allocation4], 0 }
   0x3   :  { %11 = vsyncpa [#allocation4 + $0x1], 0  ;;  %s411_s6 = smov 0   ;;  %s413_s7 = smov 0  }
   0x4   :  { %s415_s8 = smov 0   ;;  %s417_s9 = smov 0  }
   0x5 LB: > { %s432_s10 = sadd.s32 4294967295, %s391_s9   ;;  %s227_s11 = sadd.s32 4294967294, %s391_s9   ;;  %s391_s9 = sphi %s417_s9, %s590_s9   ;;  %s387_s8 = sphi %s415_s8, %s589_s8   ;;  %s383_s7 = sphi %s413_s7, %s588_s7   ;;  %s379_s6 = sphi %s411_s6, %s587_s6  }
   0x6   : > { %s436_s12 = sadd.s32 1, %s391_s9   ;;  %s24_s13 = sadd.s32 1, %s387_s8 }
   0x7   : > { %s21_s14 = ssub.s32 %s391_s9, %s436_s12  ;;  %p31_p0 = scmp.ne.s32.totalorder %s387_s8, %s383_s7 }
   0x8   : > { %p22_p1 = scmp.eq.s32.totalorder %s21_s14, 0  ;;  %p32_p2 = scmp.eq.s32.totalorder %s391_s9, 0 }
   0x9   : > { %p37_p3 = scmp.ne.s32.totalorder %s383_s7, %s379_s6  ;;  %p38_p4 = scmp.eq.s32.totalorder %s432_s10, 0 }
   0xa   : > { %s448_s15 = scalar_select %p22_p1, %s387_s8, %s24_s13  }
   0xb   : > { %p450_p5 = por %p32_p2, %p31_p0  ;;  %p454_p6 = por %p38_p4, %p37_p3 }
   0xc   : > { %p61_p7 = scmp.eq.s32.totalorder %s432_s10, 1  ;;  %p67_p8 = scmp.eq.s32.totalorder %s227_s11, 1 }
   0xd   : > { %p255_p10 = scmp.lt.s32.totalorder %s391_s9, 2  ;;  %s87_s20 = sand.u32 1, %s387_s8  }
   0xe   : > { %p461_p11 = por %p61_p7, %p31_p0  ;;  %p465_p12 = por %p67_p8, %p37_p3 }
   0xf   : > { %s241_s21 = sshll.u32 %s391_s9, 7  ;;  %s230_s22 = sshll.u32 %s87_s20, 4 }
  0x10   : > { %s580_s18 = scalar_select %p461_p11, 1, 0 }
  0x11   : > { %s581_s19 = scalar_select %p465_p12, 1, 0 }
  0x12   : > { %s474_s25 = scalar_lea.hbm %s575_s0, %s241_s21  ;;  %s91_s26 = scalar_lea.vmem [#allocation2], %s230_s22 }
  0x13   : > { %s98_s27 = sshll.u32 %s91_s26, 4  ;;  %p478_p13 = pnand %p255_p10, %p450_p5  ;;  %s482_s27 = int_to_ptr.vmem [resolvable:$true] %s98_s27 }
  0x14   : > { %s485_s29 = scalar_lea.sflag [#allocation3], %s87_s20  ;;  %s295_s30 = scalar_lea.hbm %s474_s25, 256 }
  0x15   : > { %p296_p1 = scmp.ne.s32.totalorder %s474_s25, %s295_s30  ;;  %p297_p2 = pneg %p478_p13 }
  0x16   : > { %s300_s4 = scalar_lea.hbm %s575_s0, 512  ;;  %p301_p5 = scmp.lt.u32.totalorder %s474_s25, %s575_s0 }
  0x17   : > { %p298_p3 = pnand %p297_p2, %p296_p1  ;;  %p302_p7 = scmp.lt.u32.totalorder %s300_s4, %s295_s30 }
  0x18   : > { %p304_p10 = scmp.lt.u32.totalorder %s295_s30, %s474_s25 }
  0x19   : > { %p299_p4 = pneg %p298_p3  ;;  %p303_p8 = por %p302_p7, %p301_p5 }
  0x1b   : > { %p305_p9 = por %p304_p10, %p303_p8 }
  0x1d   : > { %p306_p0 = pnand %p305_p9, %p299_p4 }
  0x1f   : > { %309 = shalt.err (!%p306_p0)
}
  0x20   : > { %s310_s13 = scalar_lea.vmem %s482_s27, 256  ;;  %s393_s14 = smov [#allocation2]  }
  0x21   : > { %p311_p1 = scmp.ne.s32.totalorder %s482_s27, %s310_s13  ;;  %s315_s16 = sshll.u32 %s393_s14, 4  ;;  %s316_s16 = int_to_ptr.vmem [resolvable:$false] %s315_s16 }
  0x22   : > { %s317_s20 = scalar_lea.vmem %s316_s16, 512  ;;  %p318_p11 = scmp.lt.s32.totalorder %s482_s27, %s316_s16 }
  0x23   : > { %p313_p3 = pnand %p311_p1, %p297_p2  ;;  %p319_p5 = scmp.lt.s32.totalorder %s317_s20, %s310_s13 }
  0x25   : > { %p314_p12 = pneg %p313_p3  ;;  %p320_p7 = por %p319_p5, %p318_p11 }
  0x27   : > { %p321_p8 = pnand %p320_p7, %p314_p12 }
  0x29   : > { %324 = shalt.err (!%p321_p8)
}
  0x2a   : > { %s394_s21 = smov 256   ;;  %s395_s22 = smov 128  }
  0x2b   : > { %s396_s23 = smov 8   ;;  %p106_p9 = scmp.lt.s32.totalorder %s391_s9, 3 }
  0x2c   : > { %250 = dma.hbm_to_vmem [thread:$0]  (!%p478_p13), %s474_s25, 256, %s482_s27, %s485_s29, %s394_s21, %s395_s22, %s396_s23  }
  0x2d   : > { %p583_p0 = scmp.ge.s32.totalorder %s391_s9, 1 }
  0x2f   : > { %p107_p2 = pnand %p583_p0, %p106_p9 }
  0x30   : > { %s517_s24 = sand.u32 (!%p107_p2), 1, %s383_s7  }
  0x31   : > { %110 = sbr.rel (%p107_p2) target bundleno = 85 (0x55), region = 24  ;;  %s234_s26 = sshll.u32 (!%p107_p2), %s517_s24, 4 }
  0x32   : > { %s113_s30 = scalar_lea.sflag (!%p107_p2), [#allocation3], %s517_s24  ;;  %s116_s2 = scalar_lea.vmem (!%p107_p2), [#allocation2], %s234_s26 }
  0x38   : > { %370 = dma.done.wait (%p454_p6), %s113_s30, 256  }
  0x39   : > { %372 = vsyncadd (%p454_p6), %s113_s30, 4294967040  ;;  %s134_s25 = scalar_lea.vmem [#allocation5], %s234_s26  ;;  %s242_s28 = sshll.u32 %s432_s10, 7  ;;  %v136_v0 = vld [vmem:[%s116_s2] sm:$0xff]  ;;  %v137_v1 = vld [vmem:[%s116_s2 + $0x8] sm:$0xff] }
  0x3a   : > { %s154_s27 = sshll.u32 %s134_s25, 4  ;;  %s531_s4 = scalar_lea.hbm %s576_s1, %s242_s28  ;;  %138 = vst [vmem:[%s134_s25] sm:$0xff] %v136_v0  ;;  %139 = vst [vmem:[%s134_s25 + $0x8] sm:$0xff] %v137_v1  ;;  %s526_s27 = int_to_ptr.vmem [resolvable:$true] %s154_s27 }
  0x3b   : > { %s141_s17 = scalar_lea.sflag [#allocation4], %s517_s24  ;;  %s325_s5 = scalar_lea.vmem %s526_s27, 256 }
  0x3c   : > { %p326_p6 = scmp.ne.s32.totalorder %s526_s27, %s325_s5  ;;  %p584_p11 = scmp.ne.s32.totalorder %s580_s18, 0 }
  0x3d   : > { %s397_s10 = smov [#allocation5]  }
  0x3e   : > { %p327_p12 = pnand %p326_p6, %p584_p11  ;;  %s329_s11 = sshll.u32 %s397_s10, 4  ;;  %s330_s11 = int_to_ptr.vmem [resolvable:$false] %s329_s11 }
  0x3f   : > { %s331_s13 = scalar_lea.vmem %s330_s11, 512  ;;  %p332_p4 = scmp.lt.s32.totalorder %s526_s27, %s330_s11 }
  0x40   : > { %p328_p13 = pneg %p327_p12  ;;  %p333_p10 = scmp.lt.s32.totalorder %s331_s13, %s325_s5 }
  0x42   : > { %p334_p1 = por %p333_p10, %p332_p4 }
  0x44   : > { %p335_p3 = pnand %p334_p1, %p328_p13 }
  0x46   : > { %338 = shalt.err (!%p335_p3)
}
  0x47   : > { %s339_s14 = scalar_lea.hbm %s531_s4, 256  ;;  %s343_s21 = scalar_lea.hbm %s576_s1, 512 }
  0x48   : > { %p340_p5 = scmp.ne.s32.totalorder %s531_s4, %s339_s14  ;;  %p344_p9 = scmp.lt.u32.totalorder %s531_s4, %s576_s1 }
  0x49   : > { %p345_p0 = scmp.lt.u32.totalorder %s343_s21, %s339_s14  ;;  %p347_p6 = scmp.lt.u32.totalorder %s339_s14, %s531_s4 }
  0x4a   : > { %p341_p7 = pnand %p340_p5, %p584_p11 }
  0x4b   : > { %p346_p2 = por %p345_p0, %p344_p9 }
  0x4c   : > { %p342_p8 = pneg %p341_p7 }
  0x4d   : > { %p348_p12 = por %p347_p6, %p346_p2 }
  0x4f   : > { %p349_p13 = pnand %p348_p12, %p342_p8 }
  0x51   : > { %352 = shalt.err (!%p349_p13)
}
  0x52   : > { %s398_s26 = smov 128   ;;  %s399_s30 = smov 256  }
  0x53   : > { %s400_s2 = smov 8  }
  0x54   : > { %245 = dma.vmem_to_hbm [thread:$0]  (%p584_p11), %s526_s27, 256, %s531_s4, %s141_s17, %s398_s26, %s399_s30, %s400_s2  }
  0x55 PF: > { %s169_s25 = sand.u32 1, %s379_s6   ;;  %p585_p4 = scmp.ne.s32.totalorder %s581_s19, 0 }
  0x56   : > { %p586_p10 = scmp.ge.s32.totalorder %s391_s9, 2  ;;  %s170_s28 = scalar_lea.sflag [#allocation4], %s169_s25 }
  0x58   : > { %p252_p1 = pnand %p586_p10, %p585_p4 }
  0x5a   : > { %374 = dma.done.wait (!%p252_p1), %s170_s28, 256  }
  0x5b   : > { %376 = vsyncadd (!%p252_p1), %s170_s28, 4294967040  ;;  %p14_p3 = scmp.ge.s32.totalorder %s436_s12, 4   ;;  %s587_s6 = smov %s383_s7 }
  0x5c   : > { %s588_s7 = smov %s387_s8  ;;  %s589_s8 = smov %s448_s15 }
  0x5d   : > { %s590_s9 = smov %s436_s12  ;;  %16 = sbr.rel (!%p14_p3) target bundleno = 5 (0x5), region = 69 }
  0x64   :  { %175 = vsyncpa [#allocation3], 1 }
  0x65   :  { %177 = vsyncpa [#allocation3 + $0x1], 1 }
  0x66   :  { %178 = vsyncpa [#allocation4], 1 }
  0x67   :  { %180 = vsyncpa [#allocation4 + $0x1], 1 }

</bundles_post_ra>
